<compile_context>
chip_gen: v7x
topology: tpu7x:2x2x1
jax: 0.10.0
libtpu: 0.0.40
codegen_flags: <defaults>
</compile_context>

<pallas_src>
import functools

import jax
import jax.numpy as jnp
from jax.experimental import pallas as pl
from jax.experimental.pallas import tpu as pltpu

LANE = 128


def _round_up(n, m):
    return ((n + m - 1) // m) * m


def _stacked_lstm_kernel(x_ref, h0_ref, c0_ref, w_ref, h1_ref, c1_ref, z_ref,
                         *, H, Dsec):
    """One LSTM layer per grid step; z_ref carries [x||h||1] across layers."""
    layer = pl.program_id(0)
    B, Kp = z_ref.shape
    Din = x_ref.shape[-1]

    @pl.when(layer == 0)
    def _():
        # External input into the "input" section of the carried operand.
        z_ref[:, :Din] = x_ref[...].astype(z_ref.dtype)
        if Din < Dsec:  # static branch; scratch is uninitialized -> must zero
            z_ref[:, Din:Dsec] = jnp.zeros((B, Dsec - Din), z_ref.dtype)
        # Bias-carrier column (value 1.0) followed by zero tail padding.  The
        # corresponding weight rows hold (b_ih + b_hh) / zeros for every layer.
        tail = Kp - (Dsec + H)
        one_hot = jax.lax.broadcasted_iota(jnp.int32, (B, tail), 1) == 0
        z_ref[:, Dsec + H:] = one_hot.astype(z_ref.dtype)

    # This layer's recurrent state goes into the "hidden" section every step.
    z_ref[:, Dsec:Dsec + H] = h0_ref[...].astype(z_ref.dtype)

    # Single fused MXU matmul per layer: (B, Kp) @ (Kp, G4) -> f32 gate
    # pre-activations.  Bias is already folded into W (see packing).
    gates = jnp.dot(z_ref[...], w_ref[...], preferred_element_type=jnp.float32)

    # Dense gate layout [i | f | g | o], each H wide (PyTorch LSTMCell order).
    i_g = jax.nn.sigmoid(gates[:, 0 * H:1 * H])
    f_g = jax.nn.sigmoid(gates[:, 1 * H:2 * H])
    g_g = jnp.tanh(gates[:, 2 * H:3 * H])
    o_g = jax.nn.sigmoid(gates[:, 3 * H:4 * H])

    c_new = f_g * c0_ref[...].astype(jnp.float32) + i_g * g_g
    h_new = o_g * jnp.tanh(c_new)

    c1_ref[...] = c_new.astype(c1_ref.dtype)
    h1_ref[...] = h_new.astype(h1_ref.dtype)

    @pl.when(layer + 1 < pl.num_programs(0))
    def _():
        # Carry activation to the next layer: its W_ih rows live at K [0:H).
        # Rows [H:Dsec) of later layers are exactly zero, so any stale x
        # columns there are harmless.
        # TODO(synk): inter-layer nn.Dropout is identity here (eval mode).
        z_ref[:, :H] = h_new.astype(z_ref.dtype)


def pack_params(layer_params, input_size, hidden_size, dtype=jnp.bfloat16):
    """Pack per-layer PyTorch-shaped LSTMCell params into the kernel layout.

    layer_params: list of (w_ih (4H,Din), w_hh (4H,H), b_ih (4H,), b_hh (4H,)).
    Returns W_packed of shape (L, Kp, G4) with:
      rows [0:d_in)        = W_ih^T            (d_in = Din for layer 0, H after)
      rows [Dsec:Dsec+H)   = W_hh^T
      row  Dsec+H          = b_ih + b_hh       (bias folded; z column is 1.0)
      all other rows       = 0                 (cancel stale z columns)
    Gate columns are packed densely: [i | f | g | o], padded to G4 = 4H->128x.
    """
    H = hidden_size
    Dsec = max(input_size, H)
    Kp = _round_up(Dsec + H + 1, 16)          # 16: bf16 sublane-pair friendly
    G4 = _round_up(4 * H, LANE)
    w_all = []
    for (w_ih, w_hh, b_ih, b_hh) in layer_params:
        d_in = w_ih.shape[1]
        w = jnp.zeros((Kp, G4), jnp.float32)
        w = w.at[:d_in, :4 * H].set(jnp.transpose(w_ih.astype(jnp.float32)))
        w = w.at[Dsec:Dsec + H, :4 * H].set(jnp.transpose(w_hh.astype(jnp.float32)))
        w = w.at[Dsec + H, :4 * H].set((b_ih + b_hh).astype(jnp.float32))
        w_all.append(w.astype(dtype))
    return jnp.stack(w_all)


def _pick_vmem_limit(need_bytes):
    """Always return an explicit scoped-VMEM limit with per-chip headroom."""
    try:
        info = pltpu.get_tpu_info()
        cap = int(getattr(info, "vmem_capacity_bytes", 64 << 20) or (64 << 20))
    except Exception:
        cap = 64 << 20                      # conservative (v7x physical VMEM)
    hard_cap = int(cap * 0.8)               # ~51 MiB on v7x, ~102 MiB v5e/v6e
    want = max(32 << 20, int(2 * need_bytes) + (4 << 20))
    return min(hard_cap, want)


def stacked_lstm_forward(x, h_0, c_0, w_packed, hidden_size):
    """
    Mirrors StackedLSTM.forward (eval mode).
      x        : (B, input_size)   f32 activations
      h_0, c_0 : (L, B, H)         f32 states
      w_packed : (L, Kp, G4)       from pack_params() (bf16 by default)
    Returns (out, (h_1, c_1)) with out = h_1[-1], shapes matching PyTorch.
    """
    B, d_in = x.shape
    L, Bh, H = h_0.shape
    assert Bh == B and H == hidden_size
    Dsec = max(d_in, H)
    Kp, G4 = int(w_packed.shape[1]), int(w_packed.shape[2])
    assert w_packed.shape[0] == L
    assert Kp == _round_up(Dsec + H + 1, 16)
    assert G4 == _round_up(4 * H, LANE)

    # Scoped-VMEM estimate: double-buffered per-layer weights dominate.
    w_item = jnp.dtype(w_packed.dtype).itemsize
    a_item = jnp.dtype(x.dtype).itemsize
    need = 2 * Kp * G4 * w_item                 # W blocks, 2 pipeline buffers
    need += 2 * 4 * B * H * a_item              # h0/c0/h1/c1 blocks, 2 buffers
    need += B * d_in * a_item                   # resident x
    need += B * Kp * w_item                     # z carry scratch
    need += 8 * B * G4 * 4                      # f32 gate temporaries
    vmem_limit = _pick_vmem_limit(need)

    grid_spec = pltpu.PrefetchScalarGridSpec(
        num_scalar_prefetch=0,
        grid=(L,),
        in_specs=[
            pl.BlockSpec((B, d_in), lambda l: (0, 0)),            # x (resident)
            pl.BlockSpec((None, B, H), lambda l: (l, 0, 0)),      # h_0[l]
            pl.BlockSpec((None, B, H), lambda l: (l, 0, 0)),      # c_0[l]
            pl.BlockSpec((None, Kp, G4), lambda l: (l, 0, 0)),    # W[l]
        ],
        out_specs=(
            pl.BlockSpec((None, B, H), lambda l: (l, 0, 0)),      # h_1[l]
            pl.BlockSpec((None, B, H), lambda l: (l, 0, 0)),      # c_1[l]
        ),
        scratch_shapes=[pltpu.VMEM((B, Kp), w_packed.dtype)],     # carried z
    )

    h_1, c_1 = pl.pallas_call(
        functools.partial(_stacked_lstm_kernel, H=H, Dsec=Dsec),
        out_shape=(jax.ShapeDtypeStruct((L, B, H), h_0.dtype),
                   jax.ShapeDtypeStruct((L, B, H), c_0.dtype)),
        grid_spec=grid_spec,
        input_output_aliases={1: 0, 2: 1},    # h_0 -> h_1, c_0 -> c_1
        compiler_params=pltpu.CompilerParams(
            dimension_semantics=("arbitrary",),   # layers are a serial chain
            vmem_limit_bytes=vmem_limit,
        ),
    )(x, h_0, c_0, w_packed)

    out = h_1[-1]   # dropout never applied to the last layer's output
    return out, (h_1, c_1)


def init_torch_style_params(key, num_layers, input_size, hidden_size,
                            dtype=jnp.float32):
    """Deterministic init matching PyTorch LSTMCell parameter shapes."""
    params = []
    d_in = input_size
    k = 1.0 / (hidden_size ** 0.5)
    for _ in range(num_layers):
        key, k1, k2, k3, k4 = jax.random.split(key, 5)
        w_ih = jax.random.uniform(k1, (4 * hidden_size, d_in), dtype, -k, k)
        w_hh = jax.random.uniform(k2, (4 * hidden_size, hidden_size), dtype, -k, k)
        b_ih = jax.random.uniform(k3, (4 * hidden_size,), dtype, -k, k)
        b_hh = jax.random.uniform(k4, (4 * hidden_size,), dtype, -k, k)
        params.append((w_ih, w_hh, b_ih, b_hh))
        d_in = hidden_size
    return params


def reference_forward(x, h_0, c_0, params):
    """Pure-JAX f32 reference of the same math (PyTorch LSTMCell semantics)."""
    f32 = jnp.float32
    inp = x.astype(f32)
    h0, c0 = h_0.astype(f32), c_0.astype(f32)
    H = h_0.shape[-1]
    h_list, c_list = [], []
    for i, (w_ih, w_hh, b_ih, b_hh) in enumerate(params):
        w_ih, w_hh = w_ih.astype(f32), w_hh.astype(f32)
        gates = inp @ w_ih.T + h0[i] @ w_hh.T + b_ih.astype(f32) + b_hh.astype(f32)
        ig = jax.nn.sigmoid(gates[:, :H])
        fg = jax.nn.sigmoid(gates[:, H:2 * H])
        gg = jnp.tanh(gates[:, 2 * H:3 * H])
        og = jax.nn.sigmoid(gates[:, 3 * H:])
        c_i = fg * c0[i] + ig * gg
        h_i = og * jnp.tanh(c_i)
        inp = h_i
        h_list.append(h_i)
        c_list.append(c_i)
    return inp, (jnp.stack(h_list), jnp.stack(c_list))


def _run_case(num_layers, input_size, hidden_size, batch, w_dtype, atol):
    key = jax.random.PRNGKey(0)
    key, kx, kh, kc, kp = jax.random.split(key, 5)
    x = jax.random.normal(kx, (batch, input_size), jnp.float32)
    h_0 = jax.random.normal(kh, (num_layers, batch, hidden_size), jnp.float32)
    c_0 = jax.random.normal(kc, (num_layers, batch, hidden_size), jnp.float32)
    params = init_torch_style_params(kp, num_layers, input_size, hidden_size)

    # Reference first (defensive ordering w.r.t. aliased state buffers).
    ref_out, (ref_h, ref_c) = reference_forward(x, h_0, c_0, params)

    w_packed = pack_params(params, input_size, hidden_size, dtype=w_dtype)
    out, (h_1, c_1) = stacked_lstm_forward(x, h_0, c_0, w_packed, hidden_size)
    out = jax.block_until_ready(out)
    h_1 = jax.block_until_ready(h_1)
    c_1 = jax.block_until_ready(c_1)

    assert out.shape == (batch, hidden_size)
    assert h_1.shape == (num_layers, batch, hidden_size)
    assert c_1.shape == (num_layers, batch, hidden_size)
    assert jnp.allclose(out, ref_out, atol=atol), float(jnp.max(jnp.abs(out - ref_out)))
    assert jnp.allclose(h_1, ref_h, atol=atol), float(jnp.max(jnp.abs(h_1 - ref_h)))
    assert jnp.allclose(c_1, ref_c, atol=atol), float(jnp.max(jnp.abs(c_1 - ref_c)))


if __name__ == "__main__":
    # Exact-math check: f32 weights.
    _run_case(num_layers=3, input_size=48, hidden_size=32, batch=8,
              w_dtype=jnp.float32, atol=1e-4)
    # Default path: bf16-streamed weights, f32 accumulation / gate / state math.
    _run_case(num_layers=3, input_size=48, hidden_size=32, batch=8,
              w_dtype=jnp.bfloat16, atol=5e-2)
    # input_size < hidden_size path (Din < H), 4H a multiple of 128.
    _run_case(num_layers=2, input_size=24, hidden_size=64, batch=8,
              w_dtype=jnp.bfloat16, atol=5e-2)
    # Fully lane-aligned path (H multiple of 128).
    _run_case(num_layers=2, input_size=128, hidden_size=128, batch=8,
              w_dtype=jnp.bfloat16, atol=5e-2)

    print("KERNEL_OK")
</pallas_src>

<mosaic_0001>
module attributes {stable_mosaic.version = 11 : i64} {
  func.func @_stacked_lstm_kernel(%arg0: i32, %arg1: memref<8x48xf32, #tpu.memory_space<vmem>>, %arg2: memref<1x8x32xf32, #tpu.memory_space<vmem>>, %arg3: memref<1x8x32xf32, #tpu.memory_space<vmem>>, %arg4: memref<1x96x128xf32, #tpu.memory_space<vmem>>, %arg5: memref<1x8x32xf32, #tpu.memory_space<vmem>>, %arg6: memref<1x8x32xf32, #tpu.memory_space<vmem>>, %arg7: memref<8x96xf32, #tpu.memory_space<vmem>>) attributes {dimension_semantics = [#tpu.dimension_semantics<arbitrary>], iteration_bounds = array<i64: 3>, scalar_prefetch = 0 : i64, scratch_operands = 1 : i64, tpu.core_type = #tpu.core_type<tc>, window_params = [{pipeline_mode = #tpu.pipeline_mode<synchronous>, transform_indices = @transform_0, window_bounds = array<i64: 8, 48>}, {transform_indices = @transform_1, window_bounds = array<i64: 1, 8, 32>}, {transform_indices = @transform_2, window_bounds = array<i64: 1, 8, 32>}, {transform_indices = @transform_3, window_bounds = array<i64: 1, 96, 128>}, {transform_indices = @transform_4, window_bounds = array<i64: 1, 8, 32>}, {transform_indices = @transform_5, window_bounds = array<i64: 1, 8, 32>}]} {
    %c0_i32 = arith.constant 0 : i32
    %0 = arith.cmpi eq, %arg0, %c0_i32 : i32
    %1 = arith.extui %0 : i1 to i32
    %c0_i32_0 = arith.constant 0 : i32
    %2 = arith.cmpi ne, %1, %c0_i32_0 : i32
    scf.if %2 {
      %c0_22 = arith.constant 0 : index
      %c0_23 = arith.constant 0 : index
      %47 = vector.load %arg1[%c0_22, %c0_23] : memref<8x48xf32, #tpu.memory_space<vmem>>, vector<8x48xf32>
      %c0_24 = arith.constant 0 : index
      %c0_25 = arith.constant 0 : index
      %48 = vector.load %arg7[%c0_24, %c0_25] : memref<8x96xf32, #tpu.memory_space<vmem>>, vector<8x48xf32>
      tpu.vector_store %arg7[%c0_24, %c0_25], %47 {strides = array<i32>} : memref<8x96xf32, #tpu.memory_space<vmem>>, vector<8x48xf32>,
      %49 = tpu.iota {dimensions = array<i32: 1>} : vector<8x16xi32>
      %c0_i32_26 = arith.constant 0 : i32
      %50 = vector.broadcast %c0_i32_26 : i32 to vector<8x16xi32>
      %51 = arith.cmpi eq, %49, %50 : vector<8x16xi32>
      %52 = arith.extui %51 : vector<8x16xi1> to vector<8x16xi32>
      %53 = arith.sitofp %52 : vector<8x16xi32> to vector<8x16xf32>
      %c0_27 = arith.constant 0 : index
      %c80 = arith.constant 80 : index
      %54 = vector.load %arg7[%c0_27, %c80] : memref<8x96xf32, #tpu.memory_space<vmem>>, vector<8x16xf32>
      tpu.vector_store %arg7[%c0_27, %c80], %53 {strides = array<i32>} : memref<8x96xf32, #tpu.memory_space<vmem>>, vector<8x16xf32>,
    } else {
    }
    %c0 = arith.constant 0 : index
    %c0_1 = arith.constant 0 : index
    %c0_2 = arith.constant 0 : index
    %3 = vector.load %arg2[%c0, %c0_1, %c0_2] : memref<1x8x32xf32, #tpu.memory_space<vmem>>, vector<1x8x32xf32>
    %4 = vector.shape_cast %3 : vector<1x8x32xf32> to vector<8x32xf32>
    %c0_3 = arith.constant 0 : index
    %c48 = arith.constant 48 : index
    %5 = vector.load %arg7[%c0_3, %c48] : memref<8x96xf32, #tpu.memory_space<vmem>>, vector<8x32xf32>
    tpu.vector_store %arg7[%c0_3, %c48], %4 {strides = array<i32>} : memref<8x96xf32, #tpu.memory_space<vmem>>, vector<8x32xf32>,
    %c0_4 = arith.constant 0 : index
    %c0_5 = arith.constant 0 : index
    %6 = vector.load %arg7[%c0_4, %c0_5] : memref<8x96xf32, #tpu.memory_space<vmem>>, vector<8x96xf32>
    %c0_6 = arith.constant 0 : index
    %c0_7 = arith.constant 0 : index
    %c0_8 = arith.constant 0 : index
    %7 = vector.load %arg4[%c0_6, %c0_7, %c0_8] : memref<1x96x128xf32, #tpu.memory_space<vmem>>, vector<1x96x128xf32>
    %8 = vector.shape_cast %7 : vector<1x96x128xf32> to vector<96x128xf32>
    %cst = arith.constant dense<0.000000e+00> : vector<8x128xf32>
    %9 = tpu.matmul %6, %8, %cst {dimension_numbers = #tpu.dot_dimension_numbers<[1], [0], [0], [1], [0, 0, 1, 1], [], []>} : vector<8x96xf32>, vector<96x128xf32>, vector<8x128xf32> -> vector<8x128xf32>
    %10 = vector.extract_strided_slice %9 {offsets = [0, 0], sizes = [8, 32], strides = [1, 1]} : vector<8x128xf32> to vector<8x32xf32>
    %11 = arith.negf %10 : vector<8x32xf32>
    %12 = math.exp %11 : vector<8x32xf32>
    %cst_9 = arith.constant 1.000000e+00 : f32
    %13 = vector.broadcast %cst_9 : f32 to vector<8x32xf32>
    %14 = arith.addf %13, %12 : vector<8x32xf32>
    %15 = arith.divf %13, %14 : vector<8x32xf32>
    %16 = vector.extract_strided_slice %9 {offsets = [0, 32], sizes = [8, 32], strides = [1, 1]} : vector<8x128xf32> to vector<8x32xf32>
    %17 = arith.negf %16 : vector<8x32xf32>
    %18 = math.exp %17 : vector<8x32xf32>
    %cst_10 = arith.constant 1.000000e+00 : f32
    %19 = vector.broadcast %cst_10 : f32 to vector<8x32xf32>
    %20 = arith.addf %19, %18 : vector<8x32xf32>
    %21 = arith.divf %19, %20 : vector<8x32xf32>
    %22 = vector.extract_strided_slice %9 {offsets = [0, 64], sizes = [8, 32], strides = [1, 1]} : vector<8x128xf32> to vector<8x32xf32>
    %23 = math.tanh %22 : vector<8x32xf32>
    %24 = vector.extract_strided_slice %9 {offsets = [0, 96], sizes = [8, 32], strides = [1, 1]} : vector<8x128xf32> to vector<8x32xf32>
    %25 = arith.negf %24 : vector<8x32xf32>
    %26 = math.exp %25 : vector<8x32xf32>
    %cst_11 = arith.constant 1.000000e+00 : f32
    %27 = vector.broadcast %cst_11 : f32 to vector<8x32xf32>
    %28 = arith.addf %27, %26 : vector<8x32xf32>
    %29 = arith.divf %27, %28 : vector<8x32xf32>
    %c0_12 = arith.constant 0 : index
    %c0_13 = arith.constant 0 : index
    %c0_14 = arith.constant 0 : index
    %30 = vector.load %arg3[%c0_12, %c0_13, %c0_14] : memref<1x8x32xf32, #tpu.memory_space<vmem>>, vector<1x8x32xf32>
    %31 = vector.shape_cast %30 : vector<1x8x32xf32> to vector<8x32xf32>
    %32 = arith.mulf %21, %31 : vector<8x32xf32>
    %33 = arith.mulf %15, %23 : vector<8x32xf32>
    %34 = arith.addf %32, %33 : vector<8x32xf32>
    %35 = math.tanh %34 : vector<8x32xf32>
    %36 = arith.mulf %29, %35 : vector<8x32xf32>
    %c0_15 = arith.constant 0 : index
    %c0_16 = arith.constant 0 : index
    %c0_17 = arith.constant 0 : index
    %37 = vector.load %arg6[%c0_15, %c0_16, %c0_17] : memref<1x8x32xf32, #tpu.memory_space<vmem>>, vector<1x8x32xf32>
    %38 = vector.shape_cast %37 : vector<1x8x32xf32> to vector<8x32xf32>
    %39 = vector.shape_cast %34 : vector<8x32xf32> to vector<1x8x32xf32>
    tpu.vector_store %arg6[%c0_15, %c0_16, %c0_17], %39 {strides = array<i32>} : memref<1x8x32xf32, #tpu.memory_space<vmem>>, vector<1x8x32xf32>,
    %c0_18 = arith.constant 0 : index
    %c0_19 = arith.constant 0 : index
    %c0_20 = arith.constant 0 : index
    %40 = vector.load %arg5[%c0_18, %c0_19, %c0_20] : memref<1x8x32xf32, #tpu.memory_space<vmem>>, vector<1x8x32xf32>
    %41 = vector.shape_cast %40 : vector<1x8x32xf32> to vector<8x32xf32>
    %42 = vector.shape_cast %36 : vector<8x32xf32> to vector<1x8x32xf32>
    tpu.vector_store %arg5[%c0_18, %c0_19, %c0_20], %42 {strides = array<i32>} : memref<1x8x32xf32, #tpu.memory_space<vmem>>, vector<1x8x32xf32>,
    %c1_i32 = arith.constant 1 : i32
    %43 = arith.addi %arg0, %c1_i32 : i32
    %c3_i32 = arith.constant 3 : i32
    %44 = arith.cmpi slt, %43, %c3_i32 : i32
    %45 = arith.extui %44 : i1 to i32
    %c0_i32_21 = arith.constant 0 : i32
    %46 = arith.cmpi ne, %45, %c0_i32_21 : i32
    scf.if %46 {
      %c0_22 = arith.constant 0 : index
      %c0_23 = arith.constant 0 : index
      %47 = vector.load %arg7[%c0_22, %c0_23] : memref<8x96xf32, #tpu.memory_space<vmem>>, vector<8x32xf32>
      tpu.vector_store %arg7[%c0_22, %c0_23], %36 {strides = array<i32>} : memref<8x96xf32, #tpu.memory_space<vmem>>, vector<8x32xf32>,
    } else {
    }
    return
  }
  func.func @transform_0(%arg0: i32) -> (i32, i32) {
    %c0_i32 = arith.constant 0 : i32
    %c0_i32_0 = arith.constant 0 : i32
    %c0_i32_1 = arith.constant 0 : i32
    return %c0_i32, %c0_i32_0 : i32, i32
  }
  func.func @transform_1(%arg0: i32) -> (i32, i32, i32) {
    %c0_i32 = arith.constant 0 : i32
    %c0_i32_0 = arith.constant 0 : i32
    %c0_i32_1 = arith.constant 0 : i32
    return %arg0, %c0_i32, %c0_i32_0 : i32, i32, i32
  }
  func.func @transform_2(%arg0: i32) -> (i32, i32, i32) {
    %c0_i32 = arith.constant 0 : i32
    %c0_i32_0 = arith.constant 0 : i32
    %c0_i32_1 = arith.constant 0 : i32
    return %arg0, %c0_i32, %c0_i32_0 : i32, i32, i32
  }
  func.func @transform_3(%arg0: i32) -> (i32, i32, i32) {
    %c0_i32 = arith.constant 0 : i32
    %c0_i32_0 = arith.constant 0 : i32
    %c0_i32_1 = arith.constant 0 : i32
    return %arg0, %c0_i32, %c0_i32_0 : i32, i32, i32
  }
  func.func @transform_4(%arg0: i32) -> (i32, i32, i32) {
    %c0_i32 = arith.constant 0 : i32
    %c0_i32_0 = arith.constant 0 : i32
    %c0_i32_1 = arith.constant 0 : i32
    return %arg0, %c0_i32, %c0_i32_0 : i32, i32, i32
  }
  func.func @transform_5(%arg0: i32) -> (i32, i32, i32) {
    %c0_i32 = arith.constant 0 : i32
    %c0_i32_0 = arith.constant 0 : i32
    %c0_i32_1 = arith.constant 0 : i32
    return %arg0, %c0_i32, %c0_i32_0 : i32, i32, i32
  }
}

</mosaic_0001>

<bundles_post_ra>
// kernel: tpu_custom_call.1
= control target key start
LH: loop header
LB: loop body
LE: loop exit
PB: predicated region body
PF: predicated region fallthrough
CT: control target
= control target key end

     0   :  { %s1366_s0 = inlined_call_operand.vmem [shape: f32[8,48], index: 0, kind: input, shape index: {}]   ;;  %s1367_s1 = inlined_call_operand.hbm [shape: f32[3,8,32], index: 1, kind: input, shape index: {}, may-alias: {1,4}]   ;;  %s1368_s2 = inlined_call_operand.hbm [shape: f32[3,8,32], index: 2, kind: input, shape index: {}, may-alias: {2,5}]   ;;  %s1369_s3 = inlined_call_operand.hbm [shape: f32[3,96,128], index: 3, kind: input, shape index: {}]   ;;  %s1370_s4 = inlined_call_operand.hbm [shape: f32[3,8,32], index: 4, kind: output, shape index: {0}, may-alias: {1,4}]   ;;  %s1371_s5 = inlined_call_operand.hbm [shape: f32[3,8,32], index: 5, kind: output, shape index: {1}, may-alias: {2,5}]  }
   0x1   :  { %1376 = sst [smem:[#allocation18_spill]] %s1368_s2 }
   0x2   :  { %11 = vsyncpa [#allocation4], 0 }
   0x3   :  { %13 = vsyncpa [#allocation4 + $0x1], 0 }
   0x4   :  { %14 = vsyncpa [#allocation7], 0 }
   0x5   :  { %16 = vsyncpa [#allocation7 + $0x1], 0 }
   0x6   :  { %17 = vsyncpa [#allocation5], 0 }
   0x7   :  { %19 = vsyncpa [#allocation5 + $0x1], 0 }
   0x8   :  { %20 = vsyncpa [#allocation11], 0 }
   0x9   :  { %22 = vsyncpa [#allocation11 + $0x1], 0  ;;  %s1065_s18 = smov 0   ;;  %s1067_s19 = smov 0  }
   0xa   :  { %s1069_s20 = smov 0   ;;  %s1071_s21 = smov 0  }
   0xb LB: > { %1377 = sst [smem:[#allocation16_spill]] %s1013_s20  ;;  %s1086_s22 = sadd.s32 4294967295, %s1017_s21   ;;  %s1017_s21 = sphi %s1071_s21, %s1395_s21   ;;  %s1013_s20 = sphi %s1069_s20, %s1392_s20   ;;  %s1009_s19 = sphi %s1067_s19, %s1394_s19   ;;  %s1005_s18 = sphi %s1065_s18, %s1393_s18  }
   0xc   : > { %s660_s23 = sadd.s32 4294967294, %s1017_s21   ;;  %s1090_s24 = sadd.s32 1, %s1017_s21  }
   0xd   : > { %s56_s25 = sadd.s32 1, %s1013_s20  ;;  %s53_s26 = ssub.s32 %s1017_s21, %s1090_s24 }
   0xe   : > { %p63_p0 = scmp.ne.s32.totalorder %s1013_s20, %s1009_s19  ;;  %p54_p1 = scmp.eq.s32.totalorder %s53_s26, 0 }
   0xf   : > { %p64_p2 = scmp.eq.s32.totalorder %s1017_s21, 0  ;;  %p69_p3 = scmp.ne.s32.totalorder %s1009_s19, %s1005_s18 }
  0x10   : > { %p70_p4 = scmp.eq.s32.totalorder %s1086_s22, 0  ;;  %p145_p7 = scmp.eq.s32.totalorder %s1086_s22, 2 }
  0x11   : > { %s1102_s27 = scalar_select %p54_p1, %s1013_s20, %s56_s25  }
  0x12   : > { %p65_p5 = por %p64_p2, %p63_p0  ;;  %p1104_p6 = por %p70_p4, %p69_p3 }
  0x13   : > { %1378 = sst [smem:[#allocation17_spill]] %s1102_s27  ;;  %p151_p8 = scmp.eq.s32.totalorder %s660_s23, 2 }
  0x14   : > { %s1379_s28 = scalar_select %p1104_p6, 1, 0 }
  0x15   : > { %p772_p9 = scmp.lt.s32.totalorder %s1017_s21, 3  ;;  %p1110_p10 = por %p145_p7, %p63_p0 }
  0x16   : > { %p1114_p11 = por %p151_p8, %p69_p3  ;;  %s1119_s6 = sand.u32 1, %s1013_s20  }
  0x17   : > { %s1380_s29 = scalar_select %p1110_p10, 1, 0 }
  0x18   : > { %s1381_s30 = scalar_select %p1114_p11, 1, 0 }
  0x19   : > { %s664_s7 = sshll.u32 %s1017_s21, 7  ;;  %s1372_s8 = sshll.u32 %s1119_s6, 3 }
  0x1a   : > { %p1123_p12 = pnand %p772_p9, %p65_p5  ;;  %s218_s10 = sand.u32 1, %s1017_s21  }
  0x1b   : > { %s1383_s2 = sld [smem:[#allocation18_spill]]  ;;  %s222_s14 = scalar_lea.vmem [#allocation6], %s1372_s8 }
  0x1c   : > { %s229_s15 = sshll.u32 %s222_s14, 4  ;;  %s742_s16 = smul.u32 96, %s1119_s6  ;;  %s1137_s15 = int_to_ptr.vmem [resolvable:$true] %s229_s15 }
  0x1d   : > { %s1140_s17 = scalar_lea.sflag [#allocation7], %s218_s10  ;;  %p1146_p0 = pneg %p1123_p12 }
  0x21   : > { %s1133_s13 = scalar_lea.hbm %s1383_s2, %s664_s7  ;;  %s830_s12 = scalar_lea.hbm %s1383_s2, 384 }
  0x22   : > { %s825_s23 = scalar_lea.hbm %s1133_s13, 128  ;;  %p831_p3 = scmp.lt.u32.totalorder %s1133_s13, %s1383_s2 }
  0x23   : > { %p826_p13 = scmp.ne.s32.totalorder %s1133_s13, %s825_s23  ;;  %p832_p4 = scmp.lt.u32.totalorder %s830_s12, %s825_s23 }
  0x24   : > { %p834_p7 = scmp.lt.u32.totalorder %s825_s23, %s1133_s13 }
  0x25   : > { %p828_p1 = pnand %p1146_p0, %p826_p13  ;;  %p833_p5 = por %p832_p4, %p831_p3 }
  0x27   : > { %p829_p2 = pneg %p828_p1  ;;  %p835_p8 = por %p834_p7, %p833_p5 }
  0x29   : > { %p836_p9 = pnand %p835_p8, %p829_p2 }
  0x2b   : > { %839 = shalt.err (!%p836_p9)
}
  0x2c   : > { %s840_s10 = scalar_lea.vmem %s1137_s15, 128  ;;  %s1019_s26 = smov [#allocation6]  }
  0x2d   : > { %p841_p13 = scmp.ne.s32.totalorder %s1137_s15, %s840_s10  ;;  %s845_s11 = sshll.u32 %s1019_s26, 4  ;;  %s846_s11 = int_to_ptr.vmem [resolvable:$false] %s845_s11 }
  0x2e   : > { %s847_s8 = scalar_lea.vmem %s846_s11, 256  ;;  %p848_p10 = scmp.lt.s32.totalorder %s1137_s15, %s846_s11 }
  0x2f   : > { %p843_p1 = pnand %p841_p13, %p1146_p0  ;;  %p849_p6 = scmp.lt.s32.totalorder %s847_s8, %s840_s10 }
  0x31   : > { %p844_p11 = pneg %p843_p1  ;;  %p850_p3 = por %p849_p6, %p848_p10 }
  0x33   : > { %p851_p4 = pnand %p850_p3, %p844_p11 }
  0x35   : > { %854 = shalt.err (!%p851_p4)
}
  0x36   : > { %761 = dma.hbm_to_vmem [thread:$0]  (!%p1123_p12), %s1133_s13, 128, %s1137_s15, %s1140_s17  }
  0x37   : > { %p668_p2 = scmp.ge.s32.totalorder %s1017_s21, 1  ;;  %s240_s23 = scalar_lea.vmem [#allocation8], %s742_s16 }
  0x38   : > { %s247_s12 = sshll.u32 %s240_s23, 4  ;;  %p255_p6 = scmp.lt.s32.totalorder %s1017_s21, 4  ;;  %s1174_s12 = int_to_ptr.vmem [resolvable:$true] %s247_s12 }
  0x39   : > { %s1185_s11 = scalar_lea.hbm %s1367_s1, %s664_s7  ;;  %s1386_s8 = sshll.u32 %s1119_s6, 3 }
  0x3a   : > { %p1176_p10 = pnand %p668_p2, %p255_p6  ;;  %s204_s13 = scalar_lea.vmem [#allocation3], %s1386_s8 }
  0x3b   : > { %s211_s15 = sshll.u32 %s204_s13, 4  ;;  %s743_s16 = smul.u32 1536, %s1017_s21  ;;  %s1189_s15 = int_to_ptr.vmem [resolvable:$true] %s211_s15 }
  0x3c   : > { %s1385_s14 = scalar_select %p1176_p10, 1, 0 }
  0x3d   : > { %s201_s23 = scalar_lea.sflag [#allocation4], %s1119_s6  ;;  %s855_s2 = scalar_lea.hbm %s1185_s11, 128 }
  0x3e   : > { %p856_p11 = scmp.ne.s32.totalorder %s1185_s11, %s855_s2  ;;  %s860_s7 = scalar_lea.hbm %s1367_s1, 384 }
  0x3f   : > { %p861_p8 = scmp.lt.u32.totalorder %s1185_s11, %s1367_s1  ;;  %p862_p9 = scmp.lt.u32.totalorder %s860_s7, %s855_s2 }
  0x40   : > { %p858_p5 = pnand %p856_p11, %p1146_p0  ;;  %p864_p1 = scmp.lt.u32.totalorder %s855_s2, %s1185_s11 }
  0x41   : > { %p863_p13 = por %p862_p9, %p861_p8 }
  0x42   : > { %p859_p7 = pneg %p858_p5 }
  0x43   : > { %p865_p3 = por %p864_p1, %p863_p13 }
  0x45   : > { %p866_p4 = pnand %p865_p3, %p859_p7 }
  0x47   : > { %869 = shalt.err (!%p866_p4)
}
  0x48   : > { %s870_s6 = scalar_lea.vmem %s1189_s15, 128  ;;  %s1020_s27 = smov [#allocation3]  }
  0x49   : > { %p871_p2 = scmp.ne.s32.totalorder %s1189_s15, %s870_s6  ;;  %s875_s8 = sshll.u32 %s1020_s27, 4  ;;  %s876_s8 = int_to_ptr.vmem [resolvable:$false] %s875_s8 }
  0x4a   : > { %s877_s20 = scalar_lea.vmem %s876_s8, 256  ;;  %p878_p5 = scmp.lt.s32.totalorder %s1189_s15, %s876_s8 }
  0x4b   : > { %p873_p6 = pnand %p871_p2, %p1146_p0  ;;  %p879_p10 = scmp.lt.s32.totalorder %s877_s20, %s870_s6 }
  0x4d   : > { %p874_p11 = pneg %p873_p6  ;;  %p880_p8 = por %p879_p10, %p878_p5 }
  0x4f   : > { %p881_p9 = pnand %p880_p8, %p874_p11 }
  0x51   : > { %884 = shalt.err (!%p881_p9)
}
  0x52   : > { %758 = dma.hbm_to_vmem [thread:$0]  (!%p1123_p12), %s1185_s11, 128, %s1189_s15, %s201_s23  }
  0x53   : > { %s1219_s10 = scalar_lea.hbm %s1369_s3, %s743_s16  ;;  %s890_s27 = scalar_lea.hbm %s1369_s3, 4608 }
  0x54   : > { %s885_s7 = scalar_lea.hbm %s1219_s10, 1536  ;;  %p891_p1 = scmp.lt.u32.totalorder %s1219_s10, %s1369_s3 }
  0x55   : > { %p886_p10 = scmp.ne.s32.totalorder %s1219_s10, %s885_s7  ;;  %p892_p3 = scmp.lt.u32.totalorder %s890_s27, %s885_s7 }
  0x56   : > { %p894_p2 = scmp.lt.u32.totalorder %s885_s7, %s1219_s10 }
  0x57   : > { %p888_p7 = pnand %p886_p10, %p1146_p0  ;;  %p893_p4 = por %p892_p3, %p891_p1 }
  0x59   : > { %p889_p13 = pneg %p888_p7  ;;  %p895_p6 = por %p894_p2, %p893_p4 }
  0x5b   : > { %p896_p11 = pnand %p895_p6, %p889_p13 }
  0x5d   : > { %899 = shalt.err (!%p896_p11)
}
  0x5e   : > { %s900_s16 = scalar_lea.vmem %s1174_s12, 1536  ;;  %s1021_s23 = smov [#allocation8]  }
  0x5f   : > { %p901_p5 = scmp.ne.s32.totalorder %s1174_s12, %s900_s16  ;;  %s905_s8 = sshll.u32 %s1021_s23, 4  ;;  %s906_s8 = int_to_ptr.vmem [resolvable:$false] %s905_s8 }
  0x60   : > { %s907_s20 = scalar_lea.vmem %s906_s8, 3072  ;;  %p908_p10 = scmp.lt.s32.totalorder %s1174_s12, %s906_s8 }
  0x61   : > { %p903_p8 = pnand %p901_p5, %p1146_p0  ;;  %p909_p7 = scmp.lt.s32.totalorder %s907_s20, %s900_s16 }
  0x63   : > { %p904_p9 = pneg %p903_p8  ;;  %p910_p1 = por %p909_p7, %p908_p10 }
  0x65   : > { %p911_p3 = pnand %p910_p1, %p904_p9 }
  0x67   : > { %914 = shalt.err (!%p911_p3)
}
  0x68   : > { %s1022_s2 = smov 128   ;;  %s1023_s13 = smov 8  }
  0x69   : > { %764 = dma.hbm_to_vmem [thread:$0]  (!%p1123_p12), %s1219_s10, 1536, %s1174_s12, %s1140_s17, %s1022_s2, %s1022_s2, %s1023_s13  }
  0x6a   : > { %p1387_p0 = scmp.ne.s32.totalorder %s1385_s14, 0 }
  0x6b   : > { %s1246_s25 = sand.u32 (!%p1387_p0), 1, %s1009_s19   ;;  %p1388_p13 = scmp.ne.s32.totalorder (!%p1387_p0), %s1379_s28, 0 }
  0x6c   : > { %259 = sbr.rel (%p1387_p0) target bundleno = 1117 (0x45d), region = 36  ;;  %s1249_s7 = sshll.u32 (!%p1387_p0), %s1246_s25, 3 }
  0x6d   : > { %s262_s26 = scalar_lea.sflag (!%p1387_p0), [#allocation4], %s1246_s25  ;;  %s265_s6 = scalar_lea.vmem (!%p1387_p0), [#allocation3], %s1249_s7 }
  0x73   : > { %988 = dma.done.wait (%p1388_p13), %s262_s26, 128  }
  0x74   : > { %990 = vsyncadd (%p1388_p13), %s262_s26, 4294967168  ;;  %s270_s9 = sand.u32 1, %s1086_s22   ;;  %s274_s12 = scalar_lea.vmem [#allocation6], %s1249_s7 }
  0x75   : > { %s271_s17 = scalar_lea.sflag [#allocation7], %s270_s9 }
  0x76   : > { %992 = dma.done.wait (%p1388_p13), %s271_s17, 1664  }
  0x77   : > { %994 = vsyncadd (%p1388_p13), %s271_s17, 4294965632  ;;  %s744_s14 = smul.u32 96, %s1246_s25  ;;  %s317_s27 = scalar_lea.vmem [#allocation9], %s1249_s7 }
  0x78   : > { %s324_s11 = scalar_lea.vmem [#allocation10], %s1249_s7  ;;  %p673_p12 = scmp.ne.s32.totalorder %s1086_s22, 0 }
  0x79   : > { %s1264_s10 = scalar_lea.vmem [#allocation8], %s744_s14  ;;  %v332_v0 = vlaneseq (!%p673_p12)  ;;  %v329_v1 = vld [vmem:[%s1366_s0] sm:$0xff] (!%p673_p12)  ;;  %vm330_vm0 = vcmask (!%p673_p12), 392192   ;;  %v1024_v3 = vmov (!%p673_p12), 0.0   ;;  %s1025_s28 = smov (!%p673_p12), 80   ;;  %vm341_vm2 = vcmask (!%p673_p12), 786048  }
  0x7a   : > { %328 = sbr.rel (%p673_p12) target bundleno = 243 (0xf3), region = 52  ;;  %331 = vst.msk [vmem:[#allocation2] sm:$0xff] (!%p673_p12), %vm330_vm0, %v329_v1 }
  0x7b   : > { %v333_v2 = vand.u32 (!%p673_p12), 127, %v332_v0 }
  0x7d   : > { %vm334_vm1 = vcmp.eq.s32.totalorder (!%p673_p12), %v333_v2, 0 }
  0x7e   : > { %v674_v4 = vsel (!%p673_p12), %vm334_vm1, 1.0, %v1024_v3 }
  0x7f   : > { %338 = vrot.lane.b32.xlu0 (!%p673_p12), %v674_v4, %s1025_s28 }
  0xf1   : > { %v339_v5 = vpop.permute.xlu0 %338 }
  0xf2   : > { %342 = vst.msk [vmem:[#allocation2] sm:$0xff] %vm341_vm2, %v339_v5 }
  0xf3 PF: > { %v343_v6 = vld [vmem:[%s265_s6] sm:$0xff]  ;;  %s1026_s23 = smov 48   ;;  %v1027_v9 = vmov 0.0|0.0   ;;  %v353_v11 = vld [vmem:[%s1264_s10 + $0x10] sm:$0xff]  ;;  %v354_v12 = vld [vmem:[%s1264_s10 + $0x18] sm:$0xff]  ;;  %vm1028_vm3 = vmmov 0  }
  0xf4   : > { %v351_v7 = vld [vmem:[%s1264_s10] sm:$0xff]  ;;  %v352_v8 = vld [vmem:[%s1264_s10 + $0x8] sm:$0xff]  ;;  %345 = vrot.lane.b32.xlu0 %v343_v6, %s1026_s23  ;;  %724 = vmatprep.subr.bf16.mxu0 %v1027_v9  ;;  %v1029_v13 = vmov 0.0   ;;  %v728_v14 = vpack.c.bf16 %v354_v12, %v353_v11  ;;  %v444_v17 = vld [vmem:[%s274_s12] sm:$0xff]  ;;  %s1030_s8 = smov 32   ;;  %vm348_vm4 = vcmask 654720  }
  0xf5   : > { %v725_v10 = vpack.c.bf16 %v352_v8, %v351_v7  ;;  %721 = vmatprep.mubr.msk.f32.mxu0 %vm1028_vm3, %v1029_v13  ;;  %v355_v15 = vld [vmem:[%s1264_s10 + $0x20] sm:$0xff]  ;;  %v356_v16 = vld [vmem:[%s1264_s10 + $0x28] sm:$0xff]  ;;  %446 = vrot.lane.b32.xlu1 %v444_v17, %s1030_s8  ;;  %v357_v19 = vld [vmem:[%s1264_s10 + $0x30] sm:$0xff]  ;;  %vm363_vm5 = vcmask 785408   ;;  %s1031_s20 = smov 64   ;;  %s1032_s2 = smov 96  }
  0xf6   : > { %v731_v18 = vpack.c.bf16 %v356_v16, %v355_v15  ;;  %v358_v20 = vld [vmem:[%s1264_s10 + $0x38] sm:$0xff]  ;;  %v359_v22 = vld [vmem:[%s1264_s10 + $0x40] sm:$0xff]  ;;  %v360_v23 = vld [vmem:[%s1264_s10 + $0x48] sm:$0xff]  ;;  %vm470_vm6 = vcmask 261120   ;;  %s477_s13 = sadd.s32 1, %s1086_s22 }
  0xf7   : > { %726 = vmatpush3.bf16.msra.mxu0 %v725_v10  ;;  %v734_v21 = vpack.c.bf16 %v358_v20, %v357_v19  ;;  %v737_v24 = vpack.c.bf16 %v360_v23, %v359_v22  ;;  %v361_v25 = vld [vmem:[%s1264_s10 + $0x50] sm:$0xff]  ;;  %v362_v26 = vld [vmem:[%s1264_s10 + $0x58] sm:$0xff]  ;;  %p677_p4 = scmp.ge.s32.totalorder %s477_s13, 3 }
  0xf8   : > { %727 = vmatprep.subr.bf16.mxu0 %v1027_v9  ;;  %v740_v27 = vpack.c.bf16 %v362_v26, %v361_v25 }
  0xfb   : > { %729 = vmatpush3.bf16.msra.mxu0 %v728_v14 }
  0xfc   : > { %730 = vmatprep.subr.bf16.mxu0 %v1027_v9 }
  0xff   : > { %732 = vmatpush3.bf16.msra.mxu0 %v731_v18 }
 0x100   : > { %733 = vmatprep.subr.bf16.mxu0 %v1027_v9 }
 0x103   : > { %735 = vmatpush3.bf16.msra.mxu0 %v734_v21 }
 0x104   : > { %736 = vmatprep.subr.bf16.mxu0 %v1027_v9 }
 0x107   : > { %738 = vmatpush3.bf16.msra.mxu0 %v737_v24 }
 0x108   : > { %739 = vmatprep.subr.bf16.mxu0 %v1027_v9 }
 0x10b   : > { %741 = vmatpush3.bf16.msra.mxu0 %v740_v27 }
 0x166   : > { %v346_v28 = vpop.permute.xlu0 %345 }
 0x167   : > { %349 = vst.msk [vmem:[#allocation2] sm:$0xff] %vm348_vm4, %v346_v28  ;;  %v447_v39 = vpop.permute.xlu1 %446 }
 0x16e   : > { %v350_v29 = vld [vmem:[#allocation2] sm:$0xff] }
 0x16f   : > { %722 = vmatmul.mubr.msk.f32.vlgmr.msra.gmra.mrb[0].mxu0 %vm363_vm5, %v350_v29 }
 0x242   : > { %v433_v30 = vpop.f32.mrb[0].mxu0 }
 0x243   : > { %817 = vtanh.f32 %v433_v30  ;;  %v723_v31 = vpop.f32.mrb[1].mxu0  ;;  %v676_v33 = vmul.f32 -1.442695, %v433_v30 }
 0x245   : > { %819 = vpow2.f32 %v676_v33 }
 0x24d   : > { %v818_v32 = vpop.eup %817 }
 0x24e   : > { %451 = vrot.lane.b32.xlu0 %v818_v32, %s1031_s20 }
 0x24f   : > { %v820_v34 = vpop.eup %819 }
 0x250   : > { %v440_v35 = vadd.f32 1.0, %v820_v34 }
 0x252   : > { %821 = vrcp.f32 %v440_v35 }
 0x25c   : > { %v822_v36 = vpop.eup %821 }
 0x25d   : > { %v449_v40 = vmul.f32 %v822_v36, %v447_v39 }
 0x2c0   : > { %v452_v37 = vpop.permute.xlu0 %451 }
 0x2c1   : > { %v454_v38 = vmul.f32 %v822_v36, %v452_v37 }
 0x2c3   : > { %456 = vrot.lane.b32.xlu1 %v454_v38, %s1030_s8 }
 0x335   : > { %v457_v41 = vpop.permute.xlu1 %456 }
 0x336   : > { %v459_v42 = vadd.f32 %v457_v41, %v449_v40 }
 0x338   : > { %823 = vtanh.f32 %v459_v42  ;;  %467 = vrot.lane.b32.xlu1 %v459_v42, %s1032_s2 }
 0x342   : > { %v824_v43 = vpop.eup %823 }
 0x343   : > { %462 = vrot.lane.b32.xlu0 %v824_v43, %s1031_s20 }
 0x3aa   : > { %v468_v44 = vpop.permute.xlu1 %467 }
 0x3ab   : > { %471 = vst.msk [vmem:[%s324_s11] sm:$0xff] %vm470_vm6, %v468_v44 }
 0x3b5   : > { %v463_v45 = vpop.permute.xlu0 %462 }
 0x3b6   : > { %v465_v46 = vmul.f32 %v822_v36, %v463_v45 }
 0x3b8   : > { %473 = vrot.lane.b32.xlu0 %v465_v46, %s1030_s8 }
 0x425   : > { %481 = sbr.rel (%p677_p4) target bundleno = 1068 (0x42c), region = 56 }
 0x42a   : > { %v474_v47 = vpop.permute.xlu0 %473 }
 0x42b   : > { %476 = vst.msk [vmem:[%s317_s27] sm:$0xff] %vm470_vm6, %v474_v47  ;;  %482 = vst.msk [vmem:[#allocation2] sm:$0xff] (!%p677_p4), %vm470_vm6, %v474_v47 }
 0x42c PF: > { %s680_s26 = sshll.u32 %s1086_s22, 7  ;;  %s502_s12 = sshll.u32 %s317_s27, 4  ;;  %s503_s12 = int_to_ptr.vmem [resolvable:$true] %s502_s12 }
 0x42d   : > { %s1300_s17 = scalar_lea.hbm %s1370_s4, %s680_s26  ;;  %s484_s14 = scalar_lea.sflag [#allocation5], %s1246_s25 }
 0x42e   : > { %s915_s10 = scalar_lea.vmem %s503_s12, 128  ;;  %p1389_p6 = scmp.ne.s32.totalorder %s1380_s29, 0 }
 0x42f   : > { %p916_p2 = scmp.ne.s32.totalorder %s503_s12, %s915_s10  ;;  %s1033_s15 = smov [#allocation9]  }
 0x430   : > { %s919_s16 = sshll.u32 %s1033_s15, 4  ;;  %s920_s16 = int_to_ptr.vmem [resolvable:$false] %s919_s16 }
 0x431   : > { %p917_p11 = pnand %p916_p2, %p1389_p6  ;;  %s921_s28 = scalar_lea.vmem %s920_s16, 256 }
 0x432   : > { %p922_p8 = scmp.lt.s32.totalorder %s503_s12, %s920_s16  ;;  %p923_p9 = scmp.lt.s32.totalorder %s921_s28, %s915_s10 }
 0x433   : > { %p918_p5 = pneg %p917_p11 }
 0x434   : > { %p924_p10 = por %p923_p9, %p922_p8 }
 0x436   : > { %p925_p7 = pnand %p924_p10, %p918_p5 }
 0x438   : > { %928 = shalt.err (!%p925_p7)
}
 0x439   : > { %s929_s27 = scalar_lea.hbm %s1300_s17, 128  ;;  %s933_s20 = scalar_lea.hbm %s1370_s4, 384 }
 0x43a   : > { %p930_p1 = scmp.ne.s32.totalorder %s1300_s17, %s929_s27  ;;  %p934_p13 = scmp.lt.u32.totalorder %s1300_s17, %s1370_s4 }
 0x43b   : > { %p935_p12 = scmp.lt.u32.totalorder %s933_s20, %s929_s27  ;;  %p937_p2 = scmp.lt.u32.totalorder %s929_s27, %s1300_s17 }
 0x43c   : > { %p931_p3 = pnand %p930_p1, %p1389_p6 }
 0x43d   : > { %p936_p4 = por %p935_p12, %p934_p13 }
 0x43e   : > { %p932_p0 = pneg %p931_p3 }
 0x43f   : > { %p938_p11 = por %p937_p2, %p936_p4 }
 0x441   : > { %p939_p5 = pnand %p938_p11, %p932_p0 }
 0x443   : > { %942 = shalt.err (!%p939_p5)
}
 0x444   : > { %751 = dma.vmem_to_hbm [thread:$0]  (%p1389_p6), %s503_s12, 128, %s1300_s17, %s484_s14  }
 0x445   : > { %s1327_s10 = scalar_lea.hbm %s1371_s5, %s680_s26  ;;  %s515_s15 = sshll.u32 %s324_s11, 4  ;;  %s516_s15 = int_to_ptr.vmem [resolvable:$true] %s515_s15 }
 0x446   : > { %s489_s16 = scalar_lea.sflag [#allocation11], %s1246_s25  ;;  %s943_s28 = scalar_lea.vmem %s516_s15, 128 }
 0x447   : > { %p944_p8 = scmp.ne.s32.totalorder %s516_s15, %s943_s28  ;;  %s1034_s27 = smov [#allocation10]  }
 0x448   : > { %s947_s23 = sshll.u32 %s1034_s27, 4  ;;  %s948_s23 = int_to_ptr.vmem [resolvable:$false] %s947_s23 }
 0x449   : > { %p945_p9 = pnand %p944_p8, %p1389_p6  ;;  %s949_s8 = scalar_lea.vmem %s948_s23, 256 }
 0x44a   : > { %p950_p7 = scmp.lt.s32.totalorder %s516_s15, %s948_s23  ;;  %p951_p1 = scmp.lt.s32.totalorder %s949_s8, %s943_s28 }
 0x44b   : > { %p946_p10 = pneg %p945_p9 }
 0x44c   : > { %p952_p3 = por %p951_p1, %p950_p7 }
 0x44e   : > { %p953_p0 = pnand %p952_p3, %p946_p10 }
 0x450   : > { %956 = shalt.err (!%p953_p0)
}
 0x451   : > { %s957_s22 = scalar_lea.hbm %s1327_s10, 128  ;;  %s961_s11 = scalar_lea.hbm %s1371_s5, 384 }
 0x452   : > { %p958_p13 = scmp.ne.s32.totalorder %s1327_s10, %s957_s22  ;;  %p962_p2 = scmp.lt.u32.totalorder %s1327_s10, %s1371_s5 }
 0x453   : > { %p963_p11 = scmp.lt.u32.totalorder %s961_s11, %s957_s22  ;;  %p965_p8 = scmp.lt.u32.totalorder %s957_s22, %s1327_s10 }
 0x454   : > { %p959_p12 = pnand %p958_p13, %p1389_p6 }
 0x455   : > { %p964_p5 = por %p963_p11, %p962_p2 }
 0x456   : > { %p960_p4 = pneg %p959_p12 }
 0x457   : > { %p966_p9 = por %p965_p8, %p964_p5 }
 0x459   : > { %p967_p10 = pnand %p966_p9, %p960_p4 }
 0x45b   : > { %970 = shalt.err (!%p967_p10)
}
 0x45c   : > { %752 = dma.vmem_to_hbm [thread:$0]  (%p1389_p6), %s516_s15, 128, %s1327_s10, %s489_s16  }
 0x45d PF: > { %p773_p7 = scmp.ge.s32.totalorder %s1017_s21, 2  ;;  %s527_s12 = sand.u32 1, %s1005_s18  }
 0x45e   : > { %p1390_p1 = scmp.ne.s32.totalorder %s1381_s30, 0  ;;  %s528_s14 = scalar_lea.sflag [#allocation5], %s527_s12 }
 0x460   : > { %p766_p3 = pnand %p773_p7, %p1390_p1 }
 0x462   : > { %996 = dma.done.wait (!%p766_p3), %s528_s14, 128  }
 0x463   : > { %998 = vsyncadd (!%p766_p3), %s528_s14, 4294967168  ;;  %s537_s20 = scalar_lea.sflag [#allocation11], %s527_s12 }
 0x464   : > { %1000 = dma.done.wait (!%p766_p3), %s537_s20, 128  }
 0x465   : > { %1002 = vsyncadd (!%p766_p3), %s537_s20, 4294967168  ;;  %s1391_s2 = sld [smem:[#allocation16_spill]]  ;;  %s1392_s20 = sld [smem:[#allocation17_spill]] }
 0x466   : > { %p25_p6 = scmp.ge.s32.totalorder %s1090_s24, 5   ;;  %s1393_s18 = smov %s1009_s19 }
 0x467   : > { %s1395_s21 = smov %s1090_s24 }
 0x468   :  { %27 = sbr.rel (!%p25_p6) target bundleno = 11 (0xb), region = 130 }
 0x46b   : > { %s1394_s19 = smov %s1391_s2 }
 0x46f   :  { %542 = vsyncpa [#allocation4], 1 }
 0x470   :  { %544 = vsyncpa [#allocation4 + $0x1], 1 }
 0x471   :  { %545 = vsyncpa [#allocation7], 1 }
 0x472   :  { %547 = vsyncpa [#allocation7 + $0x1], 1 }
 0x473   :  { %548 = vsyncpa [#allocation5], 1 }
 0x474   :  { %550 = vsyncpa [#allocation5 + $0x1], 1 }
 0x475   :  { %551 = vsyncpa [#allocation11], 1 }
 0x476   :  { %553 = vsyncpa [#allocation11 + $0x1], 1 }

</bundles_post_ra>
